<compile_context>
chip_gen: v7x
topology: tpu7x:2x2x1
jax: 0.10.0
libtpu: 0.0.40
codegen_flags: <defaults>
</compile_context>

<pallas_src>
import functools

import jax
import jax.numpy as jnp
from jax.experimental import pallas as pl
from jax.experimental.pallas import tpu as pltpu


def _mlp_kernel(x_ref, se_ref, t_ref,
                w1x_ref, w1se_ref, w1t_ref, b1_ref,
                w2_ref, b2_ref,
                w3_ref, b3_ref,
                w4_ref, b4_ref,
                o_ref):
    """Fused MLP: (TB, 4+1+1) -> 128 -> 256 -> 128 -> 4."""
    x = x_ref[...]                                              # (TB, 4)  f32
    se = se_ref[...]                                            # (TB, 1)  f32
    t = t_ref[...]                                              # (TB, 1)  f32

    # ---- layer 1: concat eliminated; tiny K=4 matmul + two broadcast FMAs ----
    h = jnp.dot(x, w1x_ref[...], preferred_element_type=jnp.float32)   # (TB,128)
    h = h + se * w1se_ref[...] + t * w1t_ref[...] + b1_ref[...]
    h = jnp.maximum(h, 0.0)

    # ---- layer 2: (TB,128) -> (TB,256), MXU matmul, f32 accumulate ----
    h = jnp.dot(h.astype(w2_ref.dtype), w2_ref[...],
                preferred_element_type=jnp.float32)
    h = jnp.maximum(h + b2_ref[...], 0.0)

    # ---- layer 3: (TB,256) -> (TB,128) ----
    h = jnp.dot(h.astype(w3_ref.dtype), w3_ref[...],
                preferred_element_type=jnp.float32)
    h = jnp.maximum(h + b3_ref[...], 0.0)

    # ---- layer 4: (TB,128) -> (TB,4); natural-width store ----
    h = jnp.dot(h.astype(w4_ref.dtype), w4_ref[...],
                preferred_element_type=jnp.float32)
    o_ref[...] = (h + b4_ref[...]).astype(o_ref.dtype)


def _round_up(x, m):
    return ((x + m - 1) // m) * m


def _choose_tile_b(batch, requested):
    """Batch tile: multiple of 8 (sublane), capped at the padded batch.
    No forced multi-step split (v5e/v6e are single-TC; grid = serial loop)."""
    b8 = _round_up(max(int(batch), 1), 8)
    return max(8, min(_round_up(int(requested), 8), b8))


def pack_params(params, *, matmul_dtype=jnp.bfloat16):
    """One-time weight preprocessing, hoisted out of the per-call path.

    Feature layout of Linear(6,128): rows [0:4] <- x (4-wide diffusion state,
    same width as the model output), row [4] <- start_end (1-wide), row [5]
    <- t.  This matches torch.cat([x, start_end, t.unsqueeze(-1)], -1).
    """
    (w1, b1), (w2, b2), (w3, b3), (w4, b4) = params
    assert w1.shape == (6, 128) and w4.shape[-1] == 4, "unexpected MLP dims"

    w1 = jnp.asarray(w1, jnp.float32)
    w1x = w1[:4, :]                                    # (4, 128) f32
    w1se = w1[4:5, :]                                  # (1, 128) f32
    w1t = w1[5:6, :]                                   # (1, 128) f32
    b1p = jnp.asarray(b1, jnp.float32).reshape(1, -1)

    w2p = jnp.asarray(w2, matmul_dtype)                # (128, 256)
    b2p = jnp.asarray(b2, jnp.float32).reshape(1, -1)
    w3p = jnp.asarray(w3, matmul_dtype)                # (256, 128)
    b3p = jnp.asarray(b3, jnp.float32).reshape(1, -1)
    w4p = jnp.asarray(w4, matmul_dtype)                # (128, 4)
    b4p = jnp.asarray(b4, jnp.float32).reshape(1, -1)  # (1, 4)

    return (w1x, w1se, w1t, b1p, w2p, b2p, w3p, b3p, w4p, b4p)


@functools.partial(jax.jit, static_argnames=("tile_b",))
def conditioned_diffusion_forward(x, start_end, t, packed, *, tile_b=1024):
    """Pallas implementation of ConditionedDiffusionModel.forward.

    x:(B,4) f32, start_end:(B,1) (or (B,)), t:(B,), packed = pack_params(...).
    Returns (B, 4) f32.
    """
    B = x.shape[0]
    assert x.shape[-1] == 4, "x must be 4-wide (matches output width)"
    x = x.astype(jnp.float32)
    se = jnp.reshape(start_end, (B, 1)).astype(jnp.float32)
    t2 = jnp.reshape(t, (B, 1)).astype(jnp.float32)

    (w1x, w1se, w1t, b1, w2, b2, w3, b3, w4, b4) = packed

    tb = _choose_tile_b(B, tile_b)
    grid_b = (B + tb - 1) // tb
    b_pad = grid_b * tb
    if b_pad != B:
        pad = ((0, b_pad - B), (0, 0))
        x = jnp.pad(x, pad)
        se = jnp.pad(se, pad)
        t2 = jnp.pad(t2, pad)

    def row_map(i):      # batch-tiled operands
        return (i, 0)

    def full_map(i):     # weights / biases: same whole-array block every step
        return (0, 0)

    def wspec(w):
        return pl.BlockSpec(tuple(w.shape), full_map)

    out = pl.pallas_call(
        _mlp_kernel,
        out_shape=jax.ShapeDtypeStruct((b_pad, 4), jnp.float32),
        grid_spec=pltpu.PrefetchScalarGridSpec(
            num_scalar_prefetch=0,
            grid=(grid_b,),
            in_specs=[
                pl.BlockSpec((tb, 4), row_map),    # x
                pl.BlockSpec((tb, 1), row_map),    # start_end
                pl.BlockSpec((tb, 1), row_map),    # t
                wspec(w1x), wspec(w1se), wspec(w1t), wspec(b1),
                wspec(w2), wspec(b2),
                wspec(w3), wspec(b3),
                wspec(w4), wspec(b4),
            ],
            out_specs=pl.BlockSpec((tb, 4), row_map),
        ),
        compiler_params=pltpu.CompilerParams(
            dimension_semantics=("parallel",)),
    )(x, se, t2, w1x, w1se, w1t, b1, w2, b2, w3, b3, w4, b4)

    if b_pad != B:
        out = out[:B]
    return out


def init_params(key):
    """nn.Linear-style init (uniform +-1/sqrt(fan_in)); weights stored (in, out)
    so y = x @ W + b matches PyTorch's y = x @ W_torch.T + b."""
    dims = [(6, 128), (128, 256), (256, 128), (128, 4)]
    params = []
    for (fan_in, fan_out) in dims:
        key, kw, kb = jax.random.split(key, 3)
        bound = 1.0 / jnp.sqrt(float(fan_in))
        w = jax.random.uniform(kw, (fan_in, fan_out), jnp.float32, -bound, bound)
        b = jax.random.uniform(kb, (fan_out,), jnp.float32, -bound, bound)
        params.append((w, b))
    return params


def reference_forward(x, start_end, t, params, *, matmul_dtype=jnp.float32):
    """Plain-JAX reference. With matmul_dtype=bfloat16 it mirrors the kernel's
    mixed-precision policy (bf16 MXU operands, f32 accumulation/elementwise)."""
    h = jnp.concatenate(
        [x, jnp.reshape(start_end, (x.shape[0], 1)), t[..., None]],
        axis=-1).astype(jnp.float32)
    (w1, b1), (w2, b2), (w3, b3), (w4, b4) = params
    h = jax.nn.relu(h @ w1 + b1)                               # layer 1 in f32
    h = jax.nn.relu(jnp.dot(h.astype(matmul_dtype), w2.astype(matmul_dtype),
                            preferred_element_type=jnp.float32) + b2)
    h = jax.nn.relu(jnp.dot(h.astype(matmul_dtype), w3.astype(matmul_dtype),
                            preferred_element_type=jnp.float32) + b3)
    return (jnp.dot(h.astype(matmul_dtype), w4.astype(matmul_dtype),
                    preferred_element_type=jnp.float32) + b4)


if __name__ == "__main__":
    key = jax.random.PRNGKey(0)
    k_params, kx, ks, kt = jax.random.split(key, 4)

    params = init_params(k_params)
    packed = pack_params(params)          # one-time; reused across every call

    # Small demo batch (multiple of 8 -> single grid step, no padding).
    B = 96
    x = jax.random.normal(kx, (B, 4), jnp.float32)               # diffusion state
    start_end = jax.random.normal(ks, (B, 1), jnp.float32)       # conditioning
    t = jax.random.uniform(kt, (B,), jnp.float32, 0.0, 100.0)    # timestep

    out = conditioned_diffusion_forward(x, start_end, t, packed)
    out = jax.block_until_ready(out)
    assert out.shape == (B, 4)

    # Compare against a reference with the same mixed-precision policy.
    ref = reference_forward(x, start_end, t, params, matmul_dtype=jnp.bfloat16)
    assert jnp.allclose(out, ref, atol=2e-2, rtol=2e-2), "mismatch vs reference"

    # Second call with a ragged batch to exercise the pad/slice path.
    B2 = 37
    x2, se2, t2 = x[:B2], start_end[:B2], t[:B2]
    out2 = jax.block_until_ready(
        conditioned_diffusion_forward(x2, se2, t2, packed))
    ref2 = reference_forward(x2, se2, t2, params, matmul_dtype=jnp.bfloat16)
    assert out2.shape == (B2, 4)
    assert jnp.allclose(out2, ref2, atol=2e-2, rtol=2e-2), "mismatch (ragged B)"

    print("KERNEL_OK")
</pallas_src>

<mosaic_0001>
module attributes {stable_mosaic.version = 11 : i64} {
  func.func @_mlp_kernel(%arg0: i32, %arg1: memref<96x4xf32, #tpu.memory_space<vmem>>, %arg2: memref<96x1xf32, #tpu.memory_space<vmem>>, %arg3: memref<96x1xf32, #tpu.memory_space<vmem>>, %arg4: memref<4x128xf32, #tpu.memory_space<vmem>>, %arg5: memref<1x128xf32, #tpu.memory_space<vmem>>, %arg6: memref<1x128xf32, #tpu.memory_space<vmem>>, %arg7: memref<1x128xf32, #tpu.memory_space<vmem>>, %arg8: memref<128x256xbf16, #tpu.memory_space<vmem>>, %arg9: memref<1x256xf32, #tpu.memory_space<vmem>>, %arg10: memref<256x128xbf16, #tpu.memory_space<vmem>>, %arg11: memref<1x128xf32, #tpu.memory_space<vmem>>, %arg12: memref<128x4xbf16, #tpu.memory_space<vmem>>, %arg13: memref<1x4xf32, #tpu.memory_space<vmem>>, %arg14: memref<96x4xf32, #tpu.memory_space<vmem>>) attributes {dimension_semantics = [#tpu.dimension_semantics<parallel>], iteration_bounds = array<i64: 1>, scalar_prefetch = 0 : i64, scratch_operands = 0 : i64, tpu.core_type = #tpu.core_type<tc>, window_params = [{transform_indices = @transform_0, window_bounds = array<i64: 96, 4>}, {transform_indices = @transform_1, window_bounds = array<i64: 96, 1>}, {transform_indices = @transform_2, window_bounds = array<i64: 96, 1>}, {pipeline_mode = #tpu.pipeline_mode<synchronous>, transform_indices = @transform_3, window_bounds = array<i64: 4, 128>}, {pipeline_mode = #tpu.pipeline_mode<synchronous>, transform_indices = @transform_4, window_bounds = array<i64: 1, 128>}, {pipeline_mode = #tpu.pipeline_mode<synchronous>, transform_indices = @transform_5, window_bounds = array<i64: 1, 128>}, {pipeline_mode = #tpu.pipeline_mode<synchronous>, transform_indices = @transform_6, window_bounds = array<i64: 1, 128>}, {pipeline_mode = #tpu.pipeline_mode<synchronous>, transform_indices = @transform_7, window_bounds = array<i64: 128, 256>}, {pipeline_mode = #tpu.pipeline_mode<synchronous>, transform_indices = @transform_8, window_bounds = array<i64: 1, 256>}, {pipeline_mode = #tpu.pipeline_mode<synchronous>, transform_indices = @transform_9, window_bounds = array<i64: 256, 128>}, {pipeline_mode = #tpu.pipeline_mode<synchronous>, transform_indices = @transform_10, window_bounds = array<i64: 1, 128>}, {pipeline_mode = #tpu.pipeline_mode<synchronous>, transform_indices = @transform_11, window_bounds = array<i64: 128, 4>}, {pipeline_mode = #tpu.pipeline_mode<synchronous>, transform_indices = @transform_12, window_bounds = array<i64: 1, 4>}, {transform_indices = @transform_13, window_bounds = array<i64: 96, 4>}]} {
    %c0 = arith.constant 0 : index
    %c0_0 = arith.constant 0 : index
    %0 = vector.load %arg1[%c0, %c0_0] : memref<96x4xf32, #tpu.memory_space<vmem>>, vector<96x4xf32>
    %c0_1 = arith.constant 0 : index
    %c0_2 = arith.constant 0 : index
    %1 = vector.load %arg2[%c0_1, %c0_2] : memref<96x1xf32, #tpu.memory_space<vmem>>, vector<96x1xf32>
    %c0_3 = arith.constant 0 : index
    %c0_4 = arith.constant 0 : index
    %2 = vector.load %arg3[%c0_3, %c0_4] : memref<96x1xf32, #tpu.memory_space<vmem>>, vector<96x1xf32>
    %c0_5 = arith.constant 0 : index
    %c0_6 = arith.constant 0 : index
    %3 = vector.load %arg4[%c0_5, %c0_6] : memref<4x128xf32, #tpu.memory_space<vmem>>, vector<4x128xf32>
    %cst = arith.constant dense<0.000000e+00> : vector<96x128xf32>
    %4 = tpu.matmul %0, %3, %cst {dimension_numbers = #tpu.dot_dimension_numbers<[1], [0], [0], [1], [0, 0, 1, 1], [], []>} : vector<96x4xf32>, vector<4x128xf32>, vector<96x128xf32> -> vector<96x128xf32>
    %c0_7 = arith.constant 0 : index
    %c0_8 = arith.constant 0 : index
    %5 = vector.load %arg5[%c0_7, %c0_8] : memref<1x128xf32, #tpu.memory_space<vmem>>, vector<1x128xf32>
    %6 = vector.broadcast %1 : vector<96x1xf32> to vector<96x128xf32>
    %7 = vector.broadcast %5 : vector<1x128xf32> to vector<96x128xf32>
    %8 = arith.mulf %6, %7 : vector<96x128xf32>
    %9 = arith.addf %4, %8 : vector<96x128xf32>
    %c0_9 = arith.constant 0 : index
    %c0_10 = arith.constant 0 : index
    %10 = vector.load %arg6[%c0_9, %c0_10] : memref<1x128xf32, #tpu.memory_space<vmem>>, vector<1x128xf32>
    %11 = vector.broadcast %2 : vector<96x1xf32> to vector<96x128xf32>
    %12 = vector.broadcast %10 : vector<1x128xf32> to vector<96x128xf32>
    %13 = arith.mulf %11, %12 : vector<96x128xf32>
    %14 = arith.addf %9, %13 : vector<96x128xf32>
    %c0_11 = arith.constant 0 : index
    %c0_12 = arith.constant 0 : index
    %15 = vector.load %arg7[%c0_11, %c0_12] : memref<1x128xf32, #tpu.memory_space<vmem>>, vector<1x128xf32>
    %16 = vector.broadcast %15 : vector<1x128xf32> to vector<96x128xf32>
    %17 = arith.addf %14, %16 : vector<96x128xf32>
    %cst_13 = arith.constant 0.000000e+00 : f32
    %18 = vector.broadcast %cst_13 : f32 to vector<96x128xf32>
    %19 = arith.maximumf %17, %18 : vector<96x128xf32>
    %20 = arith.truncf %19 : vector<96x128xf32> to vector<96x128xbf16>
    %c0_14 = arith.constant 0 : index
    %c0_15 = arith.constant 0 : index
    %21 = vector.load %arg8[%c0_14, %c0_15] : memref<128x256xbf16, #tpu.memory_space<vmem>>, vector<128x256xbf16>
    %cst_16 = arith.constant dense<0.000000e+00> : vector<96x256xf32>
    %22 = tpu.matmul %20, %21, %cst_16 {dimension_numbers = #tpu.dot_dimension_numbers<[1], [0], [0], [1], [0, 0, 1, 1], [], []>} : vector<96x128xbf16>, vector<128x256xbf16>, vector<96x256xf32> -> vector<96x256xf32>
    %c0_17 = arith.constant 0 : index
    %c0_18 = arith.constant 0 : index
    %23 = vector.load %arg9[%c0_17, %c0_18] : memref<1x256xf32, #tpu.memory_space<vmem>>, vector<1x256xf32>
    %24 = vector.broadcast %23 : vector<1x256xf32> to vector<96x256xf32>
    %25 = arith.addf %22, %24 : vector<96x256xf32>
    %cst_19 = arith.constant 0.000000e+00 : f32
    %26 = vector.broadcast %cst_19 : f32 to vector<96x256xf32>
    %27 = arith.maximumf %25, %26 : vector<96x256xf32>
    %28 = arith.truncf %27 : vector<96x256xf32> to vector<96x256xbf16>
    %c0_20 = arith.constant 0 : index
    %c0_21 = arith.constant 0 : index
    %29 = vector.load %arg10[%c0_20, %c0_21] : memref<256x128xbf16, #tpu.memory_space<vmem>>, vector<256x128xbf16>
    %cst_22 = arith.constant dense<0.000000e+00> : vector<96x128xf32>
    %30 = tpu.matmul %28, %29, %cst_22 {dimension_numbers = #tpu.dot_dimension_numbers<[1], [0], [0], [1], [0, 0, 1, 1], [], []>} : vector<96x256xbf16>, vector<256x128xbf16>, vector<96x128xf32> -> vector<96x128xf32>
    %c0_23 = arith.constant 0 : index
    %c0_24 = arith.constant 0 : index
    %31 = vector.load %arg11[%c0_23, %c0_24] : memref<1x128xf32, #tpu.memory_space<vmem>>, vector<1x128xf32>
    %32 = vector.broadcast %31 : vector<1x128xf32> to vector<96x128xf32>
    %33 = arith.addf %30, %32 : vector<96x128xf32>
    %cst_25 = arith.constant 0.000000e+00 : f32
    %34 = vector.broadcast %cst_25 : f32 to vector<96x128xf32>
    %35 = arith.maximumf %33, %34 : vector<96x128xf32>
    %36 = arith.truncf %35 : vector<96x128xf32> to vector<96x128xbf16>
    %c0_26 = arith.constant 0 : index
    %c0_27 = arith.constant 0 : index
    %37 = vector.load %arg12[%c0_26, %c0_27] : memref<128x4xbf16, #tpu.memory_space<vmem>>, vector<128x4xbf16>
    %cst_28 = arith.constant dense<0.000000e+00> : vector<96x4xf32>
    %38 = tpu.matmul %36, %37, %cst_28 {dimension_numbers = #tpu.dot_dimension_numbers<[1], [0], [0], [1], [0, 0, 1, 1], [], []>} : vector<96x128xbf16>, vector<128x4xbf16>, vector<96x4xf32> -> vector<96x4xf32>
    %c0_29 = arith.constant 0 : index
    %c0_30 = arith.constant 0 : index
    %39 = vector.load %arg13[%c0_29, %c0_30] : memref<1x4xf32, #tpu.memory_space<vmem>>, vector<1x4xf32>
    %40 = vector.broadcast %39 : vector<1x4xf32> to vector<96x4xf32>
    %41 = arith.addf %38, %40 : vector<96x4xf32>
    %c0_31 = arith.constant 0 : index
    %c0_32 = arith.constant 0 : index
    %42 = vector.load %arg14[%c0_31, %c0_32] : memref<96x4xf32, #tpu.memory_space<vmem>>, vector<96x4xf32>
    tpu.vector_store %arg14[%c0_31, %c0_32], %41 {strides = array<i32>} : memref<96x4xf32, #tpu.memory_space<vmem>>, vector<96x4xf32>,
    return
  }
  func.func @transform_0(%arg0: i32) -> (i32, i32) {
    %c0_i32 = arith.constant 0 : i32
    %c0_i32_0 = arith.constant 0 : i32
    return %arg0, %c0_i32 : i32, i32
  }
  func.func @transform_1(%arg0: i32) -> (i32, i32) {
    %c0_i32 = arith.constant 0 : i32
    %c0_i32_0 = arith.constant 0 : i32
    return %arg0, %c0_i32 : i32, i32
  }
  func.func @transform_2(%arg0: i32) -> (i32, i32) {
    %c0_i32 = arith.constant 0 : i32
    %c0_i32_0 = arith.constant 0 : i32
    return %arg0, %c0_i32 : i32, i32
  }
  func.func @transform_3(%arg0: i32) -> (i32, i32) {
    %c0_i32 = arith.constant 0 : i32
    %c0_i32_0 = arith.constant 0 : i32
    %c0_i32_1 = arith.constant 0 : i32
    return %c0_i32, %c0_i32_0 : i32, i32
  }
  func.func @transform_4(%arg0: i32) -> (i32, i32) {
    %c0_i32 = arith.constant 0 : i32
    %c0_i32_0 = arith.constant 0 : i32
    %c0_i32_1 = arith.constant 0 : i32
    return %c0_i32, %c0_i32_0 : i32, i32
  }
  func.func @transform_5(%arg0: i32) -> (i32, i32) {
    %c0_i32 = arith.constant 0 : i32
    %c0_i32_0 = arith.constant 0 : i32
    %c0_i32_1 = arith.constant 0 : i32
    return %c0_i32, %c0_i32_0 : i32, i32
  }
  func.func @transform_6(%arg0: i32) -> (i32, i32) {
    %c0_i32 = arith.constant 0 : i32
    %c0_i32_0 = arith.constant 0 : i32
    %c0_i32_1 = arith.constant 0 : i32
    return %c0_i32, %c0_i32_0 : i32, i32
  }
  func.func @transform_7(%arg0: i32) -> (i32, i32) {
    %c0_i32 = arith.constant 0 : i32
    %c0_i32_0 = arith.constant 0 : i32
    %c0_i32_1 = arith.constant 0 : i32
    return %c0_i32, %c0_i32_0 : i32, i32
  }
  func.func @transform_8(%arg0: i32) -> (i32, i32) {
    %c0_i32 = arith.constant 0 : i32
    %c0_i32_0 = arith.constant 0 : i32
    %c0_i32_1 = arith.constant 0 : i32
    return %c0_i32, %c0_i32_0 : i32, i32
  }
  func.func @transform_9(%arg0: i32) -> (i32, i32) {
    %c0_i32 = arith.constant 0 : i32
    %c0_i32_0 = arith.constant 0 : i32
    %c0_i32_1 = arith.constant 0 : i32
    return %c0_i32, %c0_i32_0 : i32, i32
  }
  func.func @transform_10(%arg0: i32) -> (i32, i32) {
    %c0_i32 = arith.constant 0 : i32
    %c0_i32_0 = arith.constant 0 : i32
    %c0_i32_1 = arith.constant 0 : i32
    return %c0_i32, %c0_i32_0 : i32, i32
  }
  func.func @transform_11(%arg0: i32) -> (i32, i32) {
    %c0_i32 = arith.constant 0 : i32
    %c0_i32_0 = arith.constant 0 : i32
    %c0_i32_1 = arith.constant 0 : i32
    return %c0_i32, %c0_i32_0 : i32, i32
  }
  func.func @transform_12(%arg0: i32) -> (i32, i32) {
    %c0_i32 = arith.constant 0 : i32
    %c0_i32_0 = arith.constant 0 : i32
    %c0_i32_1 = arith.constant 0 : i32
    return %c0_i32, %c0_i32_0 : i32, i32
  }
  func.func @transform_13(%arg0: i32) -> (i32, i32) {
    %c0_i32 = arith.constant 0 : i32
    %c0_i32_0 = arith.constant 0 : i32
    return %arg0, %c0_i32 : i32, i32
  }
}

</mosaic_0001>

<bundles_post_ra>
// kernel: conditioned_diffusion_forward.1
= control target key start
LH: loop header
LB: loop body
LE: loop exit
PB: predicated region body
PF: predicated region fallthrough
CT: control target
= control target key end

     0   :  { %vm198_vm0 = vcmask 1043456   ;;  %vm161_vm1 = vcmask 31744   ;;  %v1346_v3 = vmov 0   ;;  %s1818_s3 = inlined_call_operand.vmem [shape: f32[4,128], index: 3, kind: input, shape index: {}]   ;;  %s1819_s0 = inlined_call_operand.vmem [shape: f32[96,4], index: 0, kind: input, shape index: {}]   ;;  %s1820_s1 = inlined_call_operand.vmem [shape: f32[96,1], index: 1, kind: input, shape index: {}]   ;;  %s1821_s2 = inlined_call_operand.vmem [shape: f32[96,1], index: 2, kind: input, shape index: {}]   ;;  %s1822_s7 = inlined_call_operand.vmem [shape: bf16[128,256], index: 7, kind: input, shape index: {}]   ;;  %s1823_s9 = inlined_call_operand.vmem [shape: bf16[256,128], index: 9, kind: input, shape index: {}]   ;;  %s1824_s4 = inlined_call_operand.vmem [shape: f32[1,128], index: 4, kind: input, shape index: {}]   ;;  %s1825_s5 = inlined_call_operand.vmem [shape: f32[1,128], index: 5, kind: input, shape index: {}]   ;;  %s1826_s6 = inlined_call_operand.vmem [shape: f32[1,128], index: 6, kind: input, shape index: {}]   ;;  %s1827_s11 = inlined_call_operand.vmem [shape: bf16[128,4], index: 11, kind: input, shape index: {}]   ;;  %s1828_s8 = inlined_call_operand.vmem [shape: f32[1,256], index: 8, kind: input, shape index: {}]   ;;  %s1829_s10 = inlined_call_operand.vmem [shape: f32[1,128], index: 10, kind: input, shape index: {}]   ;;  %s1830_s12 = inlined_call_operand.vmem [shape: f32[1,4], index: 12, kind: input, shape index: {}]   ;;  %s1831_s13 = inlined_call_operand.vmem [shape: f32[96,4], index: 13, kind: output, shape index: {}]  }
   0x1   :  { %v81_v0 = vld [vmem:[%s1818_s3] sm:$0xf]  ;;  %v46_v2 = vld [vmem:[%s1819_s0 + $0x8] sm:$0xff]  ;;  %1296 = vset.pattern.permute.xlu0 %v1346_v3  ;;  %1297 = vset.pattern.permute.xlu1 %v1346_v3  ;;  %v47_v4 = vld [vmem:[%s1819_s0 + $0x10] sm:$0xff] }
   0x2   :  { %v45_v1 = vld [vmem:[%s1819_s0] sm:$0xff]  ;;  %1231 = vmatprep.subr.msk.mxu0 %vm198_vm0, %v81_v0  ;;  %595 = vmatprep.mubr.bf16.mxu1 %v1346_v3  ;;  %v48_v5 = vld [vmem:[%s1819_s0 + $0x18] sm:$0xff]  ;;  %v58_v9 = vld [vmem:[%s1820_s1 + $0x8] sm:$0xff] }
   0x3   :  { %1233 = vmatprep.mubr.msk.f32.mxu0 %vm161_vm1, %v45_v1  ;;  %1232 = vmatpush3.msk.msra.mxu0 %vm198_vm0, %v81_v0  ;;  %v57_v6 = vld [vmem:[%s1820_s1] sm:$0xff]  ;;  %v70_v10 = vld [vmem:[%s1821_s2 + $0x8] sm:$0xff]  ;;  %v51_v12 = vld [vmem:[%s1819_s0 + $0x30] sm:$0xff] }
   0x4   :  { %1234 = vmatmul.mubr.msk.f32.vlgmr.msra.gmra.mrb[0].mxu0 %vm161_vm1, %v46_v2  ;;  %v69_v7 = vld [vmem:[%s1821_s2] sm:$0xff]  ;;  %85 = vperm.xlu0 %1296, %v57_v6   ;;  %v50_v11 = vld [vmem:[%s1819_s0 + $0x28] sm:$0xff]  ;;  %v59_v13 = vld [vmem:[%s1820_s1 + $0x10] sm:$0xff] }
   0x5   :  { %1236 = vmatprep.mubr.msk.f32.mxu0 %vm161_vm1, %v47_v4  ;;  %v49_v8 = vld [vmem:[%s1819_s0 + $0x20] sm:$0xff]  ;;  %330 = vperm.xlu1 %1297, %v69_v7   ;;  %v60_v14 = vld [vmem:[%s1820_s1 + $0x18] sm:$0xff]  ;;  %v71_v17 = vld [vmem:[%s1821_s2 + $0x10] sm:$0xff] }
   0x6   :  { %v52_v15 = vld [vmem:[%s1819_s0 + $0x38] sm:$0xff]  ;;  %v53_v16 = vld [vmem:[%s1819_s0 + $0x40] sm:$0xff]  ;;  %v54_v19 = vld [vmem:[%s1819_s0 + $0x48] sm:$0xff] }
   0x7   :  { %v72_v18 = vld [vmem:[%s1821_s2 + $0x18] sm:$0xff]  ;;  %v55_v20 = vld [vmem:[%s1819_s0 + $0x50] sm:$0xff]  ;;  %v61_v21 = vld [vmem:[%s1820_s1 + $0x20] sm:$0xff] }
   0x8   :  { %1237 = vmatmul.mubr.msk.f32.gmra.mrb[2].mxu0 %vm161_vm1, %v48_v5  ;;  %90 = vperm.xlu0 %1296, %v58_v9   ;;  %v62_v22 = vld [vmem:[%s1820_s1 + $0x28] sm:$0xff]  ;;  %v56_v23 = vld [vmem:[%s1819_s0 + $0x58] sm:$0xff]  ;;  %v73_v24 = vld [vmem:[%s1821_s2 + $0x20] sm:$0xff] }
   0x9   :  { %1239 = vmatprep.mubr.msk.f32.mxu0 %vm161_vm1, %v49_v8  ;;  %335 = vperm.xlu1 %1297, %v70_v10   ;;  %v74_v25 = vld [vmem:[%s1821_s2 + $0x28] sm:$0xff]  ;;  %v63_v26 = vld [vmem:[%s1820_s1 + $0x30] sm:$0xff]  ;;  %v64_v27 = vld [vmem:[%s1820_s1 + $0x38] sm:$0xff] }
   0xa   :  { %v75_v28 = vld [vmem:[%s1821_s2 + $0x30] sm:$0xff]  ;;  %v76_v29 = vld [vmem:[%s1821_s2 + $0x38] sm:$0xff]  ;;  %v65_v30 = vld [vmem:[%s1820_s1 + $0x40] sm:$0xff] }
   0xb   :  { %v66_v31 = vld [vmem:[%s1820_s1 + $0x48] sm:$0xff]  ;;  %v77_v34 = vld [vmem:[%s1821_s2 + $0x40] sm:$0xff]  ;;  %v1301_v36 = vld [vmem:[%s1822_s7 + $0x14] ss:$8 sps:$4 sm:$0xff]  }
   0xc   :  { %1240 = vmatmul.mubr.msk.f32.gmra.mrb[4].mxu0 %vm161_vm1, %v50_v11  ;;  %95 = vperm.xlu0 %1296, %v59_v13   ;;  %v1298_v32 = vld [vmem:[%s1822_s7 + $0x4] ss:$8 sps:$4 sm:$0xff]   ;;  %v1300_v33 = vld [vmem:[%s1822_s7] ss:$8 sps:$4 sm:$0xff]   ;;  %v1303_v37 = vld [vmem:[%s1822_s7 + $0x10] ss:$8 sps:$4 sm:$0xff]  }
   0xd   :  { %1242 = vmatprep.mubr.msk.f32.mxu0 %vm161_vm1, %v51_v12  ;;  %100 = vperm.xlu1 %1297, %v60_v14   ;;  %v78_v35 = vld [vmem:[%s1821_s2 + $0x48] sm:$0xff]  ;;  %v67_v39 = vld [vmem:[%s1820_s1 + $0x50] sm:$0xff]  ;;  %v68_v40 = vld [vmem:[%s1820_s1 + $0x58] sm:$0xff] }
   0xe   :  { %563 = vmatprep.subr.bf16.mxu1 %v1298_v32  ;;  %v1304_v38 = vld [vmem:[%s1822_s7 + $0x24] ss:$8 sps:$4 sm:$0xff]   ;;  %v1306_v41 = vld [vmem:[%s1822_s7 + $0x20] ss:$8 sps:$4 sm:$0xff]   ;;  %v1307_v42 = vld [vmem:[%s1822_s7 + $0x34] ss:$8 sps:$4 sm:$0xff]  }
   0xf   :  { %564 = vmatpush1.bf16.msra.mxu1 %v1300_v33  ;;  %v79_v43 = vld [vmem:[%s1821_s2 + $0x50] sm:$0xff]  ;;  %v80_v44 = vld [vmem:[%s1821_s2 + $0x58] sm:$0xff]  ;;  %v1310_v46 = vld [vmem:[%s1822_s7 + $0x44] ss:$8 sps:$4 sm:$0xff]  }
  0x10   :  { %1243 = vmatmul.mubr.msk.f32.gmra.mrb[6].mxu0 %vm161_vm1, %v52_v15  ;;  %340 = vperm.xlu0 %1296, %v71_v17   ;;  %v1309_v45 = vld [vmem:[%s1822_s7 + $0x30] ss:$8 sps:$4 sm:$0xff]   ;;  %v1312_v47 = vld [vmem:[%s1822_s7 + $0x40] ss:$8 sps:$4 sm:$0xff]   ;;  %v1313_v48 = vld [vmem:[%s1822_s7 + $0x54] ss:$8 sps:$4 sm:$0xff]  }
  0x11   :  { %1245 = vmatprep.mubr.msk.f32.mxu0 %vm161_vm1, %v53_v16  ;;  %345 = vperm.xlu1 %1297, %v72_v18   ;;  %v1315_v49 = vld [vmem:[%s1822_s7 + $0x50] ss:$8 sps:$4 sm:$0xff]   ;;  %v1316_v50 = vld [vmem:[%s1822_s7 + $0x64] ss:$8 sps:$4 sm:$0xff]   ;;  %v1318_v51 = vld [vmem:[%s1822_s7 + $0x60] ss:$8 sps:$4 sm:$0xff]  }
  0x12   :  { %565 = vmatprep.subr.bf16.mxu1 %v1301_v36  ;;  %v1319_v52 = vld [vmem:[%s1822_s7 + $0x74] ss:$8 sps:$4 sm:$0xff]   ;;  %v1321_v53 = vld [vmem:[%s1822_s7 + $0x70] ss:$8 sps:$4 sm:$0xff]   ;;  %v1322_v54 = vld [vmem:[%s1823_s9 + $0x40] sm:$0xff]  }
  0x13   :  { %566 = vmatpush1.bf16.msra.mxu1 %v1303_v37  ;;  %v1323_v55 = vld [vmem:[%s1823_s9] sm:$0xff]   ;;  %1165 = vmatprep.subr.bf16.mxu0 %v1322_v54  ;;  %v1324_v56 = vld [vmem:[%s1823_s9 + $0x48] sm:$0xff]   ;;  %v1326_v58 = vld [vmem:[%s1823_s9 + $0x50] sm:$0xff]  }
  0x14   :  { %1246 = vmatmul.mubr.msk.f32.gmra.mrb[8].mxu0 %vm161_vm1, %v54_v19  ;;  %105 = vperm.xlu0 %1296, %v61_v21   ;;  %v1325_v57 = vld [vmem:[%s1823_s9 + $0x8] sm:$0xff]   ;;  %v1327_v59 = vld [vmem:[%s1823_s9 + $0x10] sm:$0xff]   ;;  %v1328_v60 = vld [vmem:[%s1823_s9 + $0x58] sm:$0xff]  }
  0x15   :  { %1248 = vmatprep.mubr.msk.f32.mxu0 %vm161_vm1, %v55_v20  ;;  %110 = vperm.xlu1 %1297, %v62_v22   ;;  %v1329_v61 = vld [vmem:[%s1823_s9 + $0x18] sm:$0xff]   ;;  %v1330_v62 = vld [vmem:[%s1823_s9 + $0x60] sm:$0xff]   ;;  %v1332_v0 = vld [vmem:[%s1823_s9 + $0x68] sm:$0xff]  }
  0x16   :  { %567 = vmatprep.subr.bf16.mxu1 %v1304_v38  ;;  %1166 = vmatpush3.bf16.msra.mxu0 %v1323_v55  ;;  %v1331_v63 = vld [vmem:[%s1823_s9 + $0x20] sm:$0xff]  }
  0x17   :  { %568 = vmatpush1.bf16.msra.mxu1 %v1306_v41  ;;  %1167 = vmatprep.subr.bf16.mxu0 %v1324_v56  ;;  %v1627_v18 = vld [vmem:[%s1824_s4] ss:$0 sm:$0xff] }
  0x18   :  { %1249 = vmatmul.mubr.msk.f32.gmra.mrb[10].mxu0 %vm161_vm1, %v56_v23  ;;  %350 = vperm.xlu0 %1296, %v73_v24   ;;  %v1634_v21 = vld [vmem:[%s1825_s5] ss:$0 sm:$0xff] }
  0x19   :  { %355 = vperm.xlu1 %1297, %v74_v25   ;;  %569 = vmatprep.subr.bf16.mxu1 %v1307_v42 }
  0x1a   :  { %1168 = vmatpush3.bf16.msra.mxu0 %v1325_v57 }
  0x1b   :  { %570 = vmatpush1.bf16.msra.mxu1 %v1309_v45  ;;  %1169 = vmatprep.subr.bf16.mxu0 %v1326_v58 }
  0x1c   :  { %115 = vperm.xlu0 %1296, %v63_v26   ;;  %571 = vmatprep.subr.bf16.mxu1 %v1310_v46 }
  0x1d   :  { %120 = vperm.xlu1 %1297, %v64_v27  }
  0x1e   :  { %1170 = vmatpush3.bf16.msra.mxu0 %v1327_v59 }
  0x1f   :  { %572 = vmatpush1.bf16.msra.mxu1 %v1312_v47  ;;  %1171 = vmatprep.subr.bf16.mxu0 %v1328_v60 }
  0x20   :  { %360 = vperm.xlu0 %1296, %v75_v28   ;;  %573 = vmatprep.subr.bf16.mxu1 %v1313_v48 }
  0x21   :  { %365 = vperm.xlu1 %1297, %v76_v29   ;;  %v1641_v29 = vld [vmem:[%s1826_s6] ss:$0 sm:$0xff] }
  0x22   :  { %1172 = vmatpush3.bf16.msra.mxu0 %v1329_v61 }
  0x23   :  { %574 = vmatpush1.bf16.msra.mxu1 %v1315_v49  ;;  %1173 = vmatprep.subr.bf16.mxu0 %v1330_v62 }
  0x24   :  { %125 = vperm.xlu0 %1296, %v65_v30   ;;  %575 = vmatprep.subr.bf16.mxu1 %v1316_v50 }
  0x25   :  { %130 = vperm.xlu1 %1297, %v66_v31  }
  0x26   :  { %1174 = vmatpush3.bf16.msra.mxu0 %v1331_v63 }
  0x27   :  { %576 = vmatpush1.bf16.msra.mxu1 %v1318_v51  ;;  %1175 = vmatprep.subr.bf16.mxu0 %v1332_v0 }
  0x28   :  { %370 = vperm.xlu0 %1296, %v77_v34   ;;  %577 = vmatprep.subr.bf16.mxu1 %v1319_v52 }
  0x29   :  { %375 = vperm.xlu1 %1297, %v78_v35  }
  0x2b   :  { %578 = vmatpush1.bf16.msra.mxu1 %v1321_v53 }
  0x2c   :  { %135 = vperm.xlu0 %1296, %v67_v39  }
  0x2d   :  { %140 = vperm.xlu1 %1297, %v68_v40  }
  0x30   :  { %380 = vperm.xlu0 %1296, %v79_v43  }
  0x31   :  { %385 = vperm.xlu1 %1297, %v80_v44  }
  0x83   :  { %v86_v2 = vpop.permute.xlu0 %85 }
  0x84   :  { %v331_v1 = vpop.permute.xlu1 %330  ;;  %v149_v20 = vmul.f32 %v1627_v18, %v86_v2 }
  0x85   :  { %v394_v28 = vmul.f32 %v1634_v21, %v331_v1 }
  0x87   :  { %v91_v5 = vpop.permute.xlu0 %90 }
  0x88   :  { %v336_v4 = vpop.permute.xlu1 %335  ;;  %v150_v19 = vmul.f32 %v1627_v18, %v91_v5 }
  0x89   :  { %v395_v24 = vmul.f32 %v1634_v21, %v336_v4 }
  0x8b   :  { %v96_v7 = vpop.permute.xlu0 %95 }
  0x8c   :  { %v101_v6 = vpop.permute.xlu1 %100  ;;  %v151_v33 = vmul.f32 %v1627_v18, %v96_v7 }
  0x8d   :  { %v152_v31 = vmul.f32 %v1627_v18, %v101_v6 }
  0x8f   :  { %v341_v9 = vpop.permute.xlu0 %340 }
  0x90   :  { %v346_v8 = vpop.permute.xlu1 %345  ;;  %v396_v40 = vmul.f32 %v1634_v21, %v341_v9 }
  0x91   :  { %v397_v36 = vmul.f32 %v1634_v21, %v346_v8 }
  0x93   :  { %v106_v11 = vpop.permute.xlu0 %105 }
  0x94   :  { %v111_v10 = vpop.permute.xlu1 %110  ;;  %v153_v48 = vmul.f32 %v1627_v18, %v106_v11 }
  0x95   :  { %v154_v44 = vmul.f32 %v1627_v18, %v111_v10 }
  0x97   :  { %v351_v13 = vpop.permute.xlu0 %350 }
  0x98   :  { %v356_v12 = vpop.permute.xlu1 %355  ;;  %v398_v56 = vmul.f32 %v1634_v21, %v351_v13 }
  0x99   :  { %v399_v52 = vmul.f32 %v1634_v21, %v356_v12 }
  0x9b   :  { %v116_v15 = vpop.permute.xlu0 %115 }
  0x9c   :  { %v121_v14 = vpop.permute.xlu1 %120  ;;  %v155_v63 = vmul.f32 %v1627_v18, %v116_v15 }
  0x9d   :  { %v156_v60 = vmul.f32 %v1627_v18, %v121_v14 }
  0x9f   :  { %v361_v17 = vpop.permute.xlu0 %360 }
  0xa0   :  { %v366_v16 = vpop.permute.xlu1 %365  ;;  %v400_v10 = vmul.f32 %v1634_v21, %v361_v17 }
  0xa1   :  { %v401_v5 = vmul.f32 %v1634_v21, %v366_v16 }
  0xa3   :  { %v126_v25 = vpop.permute.xlu0 %125 }
  0xa4   :  { %v131_v22 = vpop.permute.xlu1 %130 }
  0xa5   :  { %v158_v14 = vmul.f32 %v1627_v18, %v131_v22 }
  0xa7   :  { %v371_v45 = vpop.permute.xlu0 %370 }
  0xa8   :  { %v376_v41 = vpop.permute.xlu1 %375  ;;  %v402_v17 = vmul.f32 %v1634_v21, %v371_v45 }
  0xab   :  { %v136_v6 = vpop.permute.xlu0 %135 }
  0xac   :  { %v141_v0 = vpop.permute.xlu1 %140 }
  0xd7   :  { %v1235_v23 = vpop.f32.mrb[0].mxu0 }
  0xd8   :  { %v274_v26 = vadd.f32 %v1235_v23, %v150_v19  ;;  %v268_v27 = vpop.f32.mrb[1].mxu0 }
  0xd9   :  { %v269_v30 = vadd.f32 %v268_v27, %v149_v20  ;;  %v157_v20 = vmul.f32 %v1627_v18, %v126_v25 }
  0xda   :  { %v407_v32 = vadd.f32 %v395_v24, %v274_v26  ;;  %v403_v26 = vmul.f32 %v1634_v21, %v376_v41 }
  0xdb   :  { %v406_v34 = vadd.f32 %v394_v28, %v269_v30  ;;  %v1238_v35 = vpop.f32.mrb[2].mxu0 }
  0xdc   :  { %v426_v37 = vadd.f32 %v1641_v29, %v407_v32  ;;  %v284_v38 = vadd.f32 %v1238_v35, %v152_v31  ;;  %v278_v39 = vpop.f32.mrb[3].mxu0  ;;  %v386_v31 = vpop.permute.xlu1 %385 }
  0xdd   :  { %v425_v42 = vadd.f32 %v1641_v29, %v406_v34  ;;  %v279_v43 = vadd.f32 %v278_v39, %v151_v33  ;;  %v160_v34 = vmul.f32 %v1627_v18, %v141_v0  ;;  %v381_v35 = vpop.permute.xlu0 %380  ;;  %v405_v41 = vmul.f32 %v1634_v21, %v386_v31 }
  0xde   :  { %v438_v46 = vmax.f32 %v426_v37, 0.0  ;;  %v409_v47 = vadd.f32 %v397_v36, %v284_v38  ;;  %v159_v37 = vmul.f32 %v1627_v18, %v136_v6  ;;  %v404_v45 = vmul.f32 %v1634_v21, %v381_v35  ;;  %v1333_v21 = vld [vmem:[%s1823_s9 + $0x28] sm:$0xff]  }
  0xdf   :  { %v437_v49 = vmax.f32 %v425_v42, 0.0  ;;  %v408_v50 = vadd.f32 %v396_v40, %v279_v43  ;;  %v1241_v51 = vpop.f32.mrb[4].mxu0  ;;  %1176 = vmatpush3.bf16.msra.mxu0 %v1333_v21 }
  0xe0   :  { %v428_v53 = vadd.f32 %v1641_v29, %v409_v47  ;;  %v294_v54 = vadd.f32 %v1241_v51, %v154_v44  ;;  %v288_v55 = vpop.f32.mrb[5].mxu0 }
  0xe1   :  { %v427_v57 = vadd.f32 %v1641_v29, %v408_v50  ;;  %v289_v58 = vadd.f32 %v288_v55, %v153_v48  ;;  %v449_v59 = vpack.c.bf16 %v438_v46, %v437_v49 }
  0xe2   :  { %v440_v61 = vmax.f32 %v428_v53, 0.0  ;;  %v411_v62 = vadd.f32 %v399_v52, %v294_v54 }
  0xe3   :  { %v439_v1 = vmax.f32 %v427_v57, 0.0  ;;  %v410_v2 = vadd.f32 %v398_v56, %v289_v58  ;;  %v1244_v4 = vpop.f32.mrb[6].mxu0  ;;  %596 = vmatmul.mubr.bf16.vlgmr.msra.gmra.mrb[0].mxu1 %v449_v59  ;;  %v1335_v58 = vld [vmem:[%s1823_s9 + $0x30] sm:$0xff]   ;;  %v1337_v59 = vld [vmem:[%s1823_s9 + $0x38] sm:$0xff]  }
  0xe4   :  { %v430_v7 = vadd.f32 %v1641_v29, %v411_v62  ;;  %v304_v8 = vadd.f32 %v1244_v4, %v156_v60  ;;  %v298_v9 = vpop.f32.mrb[7].mxu0  ;;  %605 = vmatprep.mubr.bf16.mxu1 %v1346_v3  ;;  %v1338_v60 = vld [vmem:[%s1827_s11] sm:$0xff]   ;;  %v1340_v62 = vld [vmem:[%s1827_s11 + $0x10] sm:$0xff]  }
  0xe5   :  { %v429_v11 = vadd.f32 %v1641_v29, %v410_v2  ;;  %v299_v12 = vadd.f32 %v298_v9, %v155_v63  ;;  %v450_v13 = vpack.c.bf16 %v440_v61, %v439_v1  ;;  %v1339_v61 = vld [vmem:[%s1827_s11 + $0x8] sm:$0xff]   ;;  %1279 = vmatprep.subr.bf16.mxu1 %v1338_v60  ;;  %v473_v63 = vlaneseq  ;;  %v471_v2 = vld [vmem:[%s1828_s8] sm:$0x3] }
  0xe6   :  { %v442_v15 = vmax.f32 %v430_v7, 0.0  ;;  %v413_v19 = vadd.f32 %v401_v5, %v304_v8  ;;  %1287 = vmatpush3.bf16.msra.mxu1 %v1338_v60 }
  0xe7   :  { %v441_v16 = vmax.f32 %v429_v11, 0.0  ;;  %v412_v23 = vadd.f32 %v400_v10, %v299_v12  ;;  %v1247_v24 = vpop.f32.mrb[8].mxu0  ;;  %1280 = vmatprep.subr.bf16.mxu1 %v1339_v61  ;;  %v474_v0 = vshrl.u32 %v473_v63, 7 }
  0xe8   :  { %v432_v27 = vadd.f32 %v1641_v29, %v413_v19  ;;  %v314_v28 = vadd.f32 %v1247_v24, %v158_v14  ;;  %v308_v30 = vpop.f32.mrb[9].mxu0 }
  0xe9   :  { %v431_v32 = vadd.f32 %v1641_v29, %v412_v23  ;;  %v309_v33 = vadd.f32 %v308_v30, %v157_v20  ;;  %v451_v22 = vpack.c.bf16 %v442_v15, %v441_v16  ;;  %v475_v1 = vsub.s32 0, %v474_v0 }
  0xea   :  { %v444_v25 = vmax.f32 %v432_v27, 0.0  ;;  %v415_v36 = vadd.f32 %v403_v26, %v314_v28  ;;  %1288 = vmatpush3.bf16.msra.mxu1 %v1339_v61  ;;  %v479_v4 = vsub.s32 1, %v474_v0 }
  0xeb   :  { %v443_v38 = vmax.f32 %v431_v32, 0.0  ;;  %v414_v39 = vadd.f32 %v402_v17, %v309_v33  ;;  %v1250_v40 = vpop.f32.mrb[10].mxu0  ;;  %606 = vmatmul.mubr.bf16.gmra.mrb[4].mxu1 %v450_v13  ;;  %1281 = vmatprep.subr.bf16.mxu1 %v1340_v62  ;;  %v1707_v5 = vrot.slane %v471_v2, %v475_v1 }
  0xec   :  { %v434_v42 = vadd.f32 %v1641_v29, %v415_v36  ;;  %v324_v43 = vadd.f32 %v1250_v40, %v160_v34  ;;  %v318_v44 = vpop.f32.mrb[11].mxu0  ;;  %615 = vmatprep.mubr.bf16.mxu1 %v1346_v3  ;;  %v1709_v6 = vrot.slane %v471_v2, %v479_v4 }
  0xed   :  { %v433_v46 = vadd.f32 %v1641_v29, %v414_v39  ;;  %v319_v47 = vadd.f32 %v318_v44, %v159_v37  ;;  %v452_v48 = vpack.c.bf16 %v444_v25, %v443_v38 }
  0xee   :  { %v446_v49 = vmax.f32 %v434_v42, 0.0  ;;  %v417_v18 = vadd.f32 %v405_v41, %v324_v43  ;;  %1289 = vmatpush3.bf16.msra.mxu1 %v1340_v62 }
  0xef   :  { %v445_v50 = vmax.f32 %v433_v46, 0.0  ;;  %v416_v51 = vadd.f32 %v404_v45, %v319_v47 }
  0xf0   :  { %v436_v52 = vadd.f32 %v1641_v29, %v417_v18 }
  0xf1   :  { %v435_v53 = vadd.f32 %v1641_v29, %v416_v51  ;;  %v453_v54 = vpack.c.bf16 %v446_v49, %v445_v50  ;;  %v1334_v29 = vld [vmem:[%s1823_s9 + $0x70] sm:$0xff]  }
  0xf2   :  { %v448_v55 = vmax.f32 %v436_v52, 0.0  ;;  %1177 = vmatprep.subr.bf16.mxu0 %v1334_v29 }
  0xf3   :  { %v447_v56 = vmax.f32 %v435_v53, 0.0  ;;  %616 = vmatmul.mubr.bf16.gmra.mrb[8].mxu1 %v451_v22  ;;  %1178 = vmatpush3.bf16.msra.mxu0 %v1335_v58 }
  0xf4   :  { %625 = vmatprep.mubr.bf16.mxu1 %v1346_v3 }
  0xf5   :  { %v454_v57 = vpack.c.bf16 %v448_v55, %v447_v56 }
  0xfb   :  { %626 = vmatmul.mubr.bf16.gmra.mrb[12].mxu1 %v452_v48 }
  0xfc   :  { %635 = vmatprep.mubr.bf16.mxu1 %v1346_v3 }
 0x103   :  { %636 = vmatmul.mubr.bf16.gmra.mrb[16].mxu1 %v453_v54 }
 0x104   :  { %645 = vmatprep.mubr.bf16.mxu1 %v1346_v3  ;;  %v1336_v3 = vld [vmem:[%s1823_s9 + $0x78] sm:$0xff]  }
 0x105   :  { %1179 = vmatprep.subr.bf16.mxu0 %v1336_v3 }
 0x106   :  { %1180 = vmatpush3.bf16.msra.mxu0 %v1337_v59 }
 0x107   :  { %1251 = vmatprep.subr.bf16.mxu0 %v1338_v60 }
 0x10b   :  { %646 = vmatmul.mubr.bf16.gmra.mrb[20].mxu1 %v454_v57 }
 0x1b6   :  { %v597_v7 = vpop.f32.mrb[0].mxu1 }
 0x1b7   :  { %v598_v8 = vadd.f32 %v597_v7, %v1707_v5  ;;  %v599_v9 = vpop.f32.mrb[1].mxu1 }
 0x1b8   :  { %v600_v10 = vadd.f32 %v599_v9, %v1709_v6  ;;  %v601_v11 = vpop.f32.mrb[2].mxu1 }
 0x1b9   :  { %v602_v12 = vadd.f32 %v601_v11, %v1707_v5  ;;  %v603_v13 = vpop.f32.mrb[3].mxu1  ;;  %v656_v15 = vmax.f32 %v598_v8, 0.0 }
 0x1ba   :  { %v604_v14 = vadd.f32 %v603_v13, %v1709_v6  ;;  %v657_v20 = vmax.f32 %v600_v10, 0.0 }
 0x1bb   :  { %v658_v19 = vmax.f32 %v602_v12, 0.0 }
 0x1bc   :  { %v659_v16 = vmax.f32 %v604_v14, 0.0 }
 0x1bd   :  { %v680_v23 = vpack.c.bf16 %v658_v19, %v656_v15 }
 0x1be   :  { %v681_v24 = vpack.c.bf16 %v659_v16, %v657_v20  ;;  %v607_v26 = vpop.f32.mrb[4].mxu1 }
 0x1bf   :  { %v608_v27 = vadd.f32 %v607_v26, %v1707_v5  ;;  %v609_v28 = vpop.f32.mrb[5].mxu1 }
 0x1c0   :  { %v610_v30 = vadd.f32 %v609_v28, %v1709_v6  ;;  %v611_v17 = vpop.f32.mrb[6].mxu1  ;;  %859 = vmatprep.mubr.bf16.mxu0 %v681_v24 }
 0x1c1   :  { %v612_v31 = vadd.f32 %v611_v17, %v1707_v5  ;;  %v613_v32 = vpop.f32.mrb[7].mxu1  ;;  %860 = vmatmul.mubr.bf16.vlgmr.msra.gmra.mrb[12].mxu0 %v680_v23  ;;  %v660_v22 = vmax.f32 %v608_v27, 0.0 }
 0x1c2   :  { %v614_v33 = vadd.f32 %v613_v32, %v1709_v6  ;;  %1252 = vmatpush3.bf16.msra.mxu0 %v1338_v60  ;;  %v661_v35 = vmax.f32 %v610_v30, 0.0 }
 0x1c3   :  { %v662_v34 = vmax.f32 %v612_v31, 0.0  ;;  %1253 = vmatprep.subr.bf16.mxu0 %v1339_v61 }
 0x1c4   :  { %v663_v25 = vmax.f32 %v614_v33, 0.0 }
 0x1c5   :  { %v682_v36 = vpack.c.bf16 %v662_v34, %v660_v22  ;;  %v1341_v22 = vld [vmem:[%s1827_s11 + $0x18] sm:$0xff]   ;;  %v1344_v34 = vld [vmem:[%s1827_s11 + $0x30] sm:$0xff]  }
 0x1c6   :  { %v683_v37 = vpack.c.bf16 %v663_v25, %v661_v35  ;;  %v617_v38 = vpop.f32.mrb[8].mxu1  ;;  %1254 = vmatpush3.bf16.msra.mxu0 %v1339_v61  ;;  %1282 = vmatprep.subr.bf16.mxu1 %v1341_v22  ;;  %v1345_v35 = vld [vmem:[%s1827_s11 + $0x38] sm:$0xff]  }
 0x1c7   :  { %v618_v39 = vadd.f32 %v617_v38, %v1707_v5  ;;  %v619_v40 = vpop.f32.mrb[9].mxu1  ;;  %1255 = vmatprep.subr.bf16.mxu0 %v1340_v62  ;;  %1290 = vmatpush3.bf16.msra.mxu1 %v1341_v22 }
 0x1c8   :  { %v620_v41 = vadd.f32 %v619_v40, %v1709_v6  ;;  %v621_v42 = vpop.f32.mrb[10].mxu1  ;;  %867 = vmatprep.mubr.bf16.mxu0 %v683_v37 }
 0x1c9   :  { %v622_v43 = vadd.f32 %v621_v42, %v1707_v5  ;;  %v623_v44 = vpop.f32.mrb[11].mxu1  ;;  %868 = vmatmul.mubr.bf16.gmra.mrb[16].mxu0 %v682_v36  ;;  %v664_v46 = vmax.f32 %v618_v39, 0.0  ;;  %v1753_v36 = vld [vmem:[%s1829_s10] ss:$0 sm:$0xff] }
 0x1ca   :  { %v624_v45 = vadd.f32 %v623_v44, %v1709_v6  ;;  %1256 = vmatpush3.bf16.msra.mxu0 %v1340_v62  ;;  %v665_v48 = vmax.f32 %v620_v41, 0.0 }
 0x1cb   :  { %v666_v47 = vmax.f32 %v622_v43, 0.0  ;;  %1257 = vmatprep.subr.bf16.mxu0 %v1341_v22 }
 0x1cc   :  { %v667_v49 = vmax.f32 %v624_v45, 0.0 }
 0x1cd   :  { %v684_v18 = vpack.c.bf16 %v666_v47, %v664_v46 }
 0x1ce   :  { %v685_v50 = vpack.c.bf16 %v667_v49, %v665_v48  ;;  %v627_v51 = vpop.f32.mrb[12].mxu1  ;;  %1258 = vmatpush3.bf16.msra.mxu0 %v1341_v22 }
 0x1cf   :  { %v628_v52 = vadd.f32 %v627_v51, %v1707_v5  ;;  %v629_v53 = vpop.f32.mrb[13].mxu1 }
 0x1d0   :  { %v630_v54 = vadd.f32 %v629_v53, %v1709_v6  ;;  %v631_v55 = vpop.f32.mrb[14].mxu1  ;;  %875 = vmatprep.mubr.bf16.mxu0 %v685_v50 }
 0x1d1   :  { %v632_v56 = vadd.f32 %v631_v55, %v1707_v5  ;;  %v633_v57 = vpop.f32.mrb[15].mxu1  ;;  %876 = vmatmul.mubr.bf16.gmra.mrb[20].mxu0 %v684_v18  ;;  %v668_v29 = vmax.f32 %v628_v52, 0.0 }
 0x1d2   :  { %v634_v21 = vadd.f32 %v633_v57, %v1709_v6  ;;  %v669_v3 = vmax.f32 %v630_v54, 0.0 }
 0x1d3   :  { %v670_v58 = vmax.f32 %v632_v56, 0.0 }
 0x1d4   :  { %v671_v59 = vmax.f32 %v634_v21, 0.0 }
 0x1d5   :  { %v686_v60 = vpack.c.bf16 %v670_v58, %v668_v29 }
 0x1d6   :  { %v687_v61 = vpack.c.bf16 %v671_v59, %v669_v3  ;;  %v637_v62 = vpop.f32.mrb[16].mxu1 }
 0x1d7   :  { %v638_v63 = vadd.f32 %v637_v62, %v1707_v5  ;;  %v639_v0 = vpop.f32.mrb[17].mxu1 }
 0x1d8   :  { %v640_v1 = vadd.f32 %v639_v0, %v1709_v6  ;;  %v641_v2 = vpop.f32.mrb[18].mxu1  ;;  %883 = vmatprep.mubr.bf16.mxu0 %v687_v61 }
 0x1d9   :  { %v642_v4 = vadd.f32 %v641_v2, %v1707_v5  ;;  %v643_v7 = vpop.f32.mrb[19].mxu1  ;;  %884 = vmatmul.mubr.bf16.gmra.mrb[24].mxu0 %v686_v60  ;;  %v672_v9 = vmax.f32 %v638_v63, 0.0 }
 0x1da   :  { %v644_v8 = vadd.f32 %v643_v7, %v1709_v6  ;;  %v673_v11 = vmax.f32 %v640_v1, 0.0 }
 0x1db   :  { %v674_v10 = vmax.f32 %v642_v4, 0.0 }
 0x1dc   :  { %v675_v12 = vmax.f32 %v644_v8, 0.0 }
 0x1dd   :  { %v688_v13 = vpack.c.bf16 %v674_v10, %v672_v9 }
 0x1de   :  { %v689_v14 = vpack.c.bf16 %v675_v12, %v673_v11  ;;  %v647_v15 = vpop.f32.mrb[20].mxu1 }
 0x1df   :  { %v648_v19 = vadd.f32 %v647_v15, %v1707_v5  ;;  %v649_v20 = vpop.f32.mrb[21].mxu1 }
 0x1e0   :  { %v650_v16 = vadd.f32 %v649_v20, %v1709_v6  ;;  %v651_v23 = vpop.f32.mrb[22].mxu1  ;;  %891 = vmatprep.mubr.bf16.mxu0 %v689_v14 }
 0x1e1   :  { %v652_v24 = vadd.f32 %v651_v23, %v1707_v5  ;;  %v653_v26 = vpop.f32.mrb[23].mxu1  ;;  %892 = vmatmul.mubr.bf16.gmra.mrb[28].mxu0 %v688_v13  ;;  %v676_v28 = vmax.f32 %v648_v19, 0.0  ;;  %v1342_v5 = vld [vmem:[%s1827_s11 + $0x20] sm:$0xff]  }
 0x1e2   :  { %v654_v27 = vadd.f32 %v653_v26, %v1709_v6  ;;  %v677_v17 = vmax.f32 %v650_v16, 0.0  ;;  %1259 = vmatprep.subr.bf16.mxu0 %v1342_v5  ;;  %1283 = vmatprep.subr.bf16.mxu1 %v1342_v5  ;;  %v1343_v6 = vld [vmem:[%s1827_s11 + $0x28] sm:$0xff]  }
 0x1e3   :  { %v678_v30 = vmax.f32 %v652_v24, 0.0  ;;  %1260 = vmatpush3.bf16.msra.mxu0 %v1342_v5  ;;  %1291 = vmatpush3.bf16.msra.mxu1 %v1342_v5 }
 0x1e4   :  { %v679_v31 = vmax.f32 %v654_v27, 0.0  ;;  %1261 = vmatprep.subr.bf16.mxu0 %v1343_v6  ;;  %1284 = vmatprep.subr.bf16.mxu1 %v1343_v6 }
 0x1e5   :  { %v690_v32 = vpack.c.bf16 %v678_v30, %v676_v28 }
 0x1e6   :  { %v691_v33 = vpack.c.bf16 %v679_v31, %v677_v17 }
 0x1e7   :  { %1262 = vmatpush3.bf16.msra.mxu0 %v1343_v6  ;;  %1292 = vmatpush3.bf16.msra.mxu1 %v1343_v6 }
 0x1e8   :  { %899 = vmatprep.mubr.bf16.mxu0 %v691_v33  ;;  %1263 = vmatprep.subr.bf16.mxu0 %v1344_v34 }
 0x1e9   :  { %900 = vmatmul.mubr.bf16.gmra.mrb[32].mxu0 %v690_v32  ;;  %1285 = vmatprep.subr.bf16.mxu1 %v1344_v34 }
 0x1eb   :  { %1264 = vmatpush3.bf16.msra.mxu0 %v1344_v34  ;;  %1293 = vmatpush3.bf16.msra.mxu1 %v1344_v34 }
 0x1ec   :  { %1265 = vmatprep.subr.bf16.mxu0 %v1345_v35  ;;  %1286 = vmatprep.subr.bf16.mxu1 %v1345_v35 }
 0x1ef   :  { %1266 = vmatpush3.bf16.msra.mxu0 %v1345_v35  ;;  %1294 = vmatpush3.bf16.msra.mxu1 %v1345_v35 }
 0x294   :  { %v1181_v25 = vpop.f32.mrb[12].mxu0 }
 0x295   :  { %v1182_v37 = vpop.f32.mrb[13].mxu0 }
 0x296   :  { %v1183_v38 = vadd.f32 %v1182_v37, %v1181_v25  ;;  %v1184_v39 = vpop.f32.mrb[14].mxu0 }
 0x297   :  { %v1185_v40 = vpop.f32.mrb[15].mxu0 }
 0x298   :  { %v862_v41 = vadd.f32 %v1183_v38, %v1753_v36  ;;  %v1186_v42 = vadd.f32 %v1185_v40, %v1184_v39  ;;  %v1143_v39 = vld [vmem:[%s1830_s12] ss:$0 sm:$0xff] }
 0x29a   :  { %v865_v43 = vadd.f32 %v1186_v42, %v1753_v36  ;;  %v908_v44 = vmax.f32 %v862_v41, 0.0 }
 0x29c   :  { %v909_v45 = vmax.f32 %v865_v43, 0.0  ;;  %v1187_v46 = vpop.f32.mrb[16].mxu0 }
 0x29d   :  { %v1188_v47 = vpop.f32.mrb[17].mxu0 }
 0x29e   :  { %v1189_v48 = vadd.f32 %v1188_v47, %v1187_v46  ;;  %v1190_v49 = vpop.f32.mrb[18].mxu0  ;;  %v920_v18 = vpack.c.bf16 %v909_v45, %v908_v44 }
 0x29f   :  { %v1191_v50 = vpop.f32.mrb[19].mxu0 }
 0x2a0   :  { %v870_v51 = vadd.f32 %v1189_v48, %v1753_v36  ;;  %v1192_v52 = vadd.f32 %v1191_v50, %v1190_v49  ;;  %1267 = vmatprep.mubr.bf16.mxu0 %v920_v18 }
 0x2a2   :  { %v873_v53 = vadd.f32 %v1192_v52, %v1753_v36  ;;  %v910_v54 = vmax.f32 %v870_v51, 0.0 }
 0x2a4   :  { %v911_v55 = vmax.f32 %v873_v53, 0.0  ;;  %v1193_v56 = vpop.f32.mrb[20].mxu0 }
 0x2a5   :  { %v1194_v57 = vpop.f32.mrb[21].mxu0 }
 0x2a6   :  { %v921_v21 = vpack.c.bf16 %v911_v55, %v910_v54  ;;  %v1195_v29 = vadd.f32 %v1194_v57, %v1193_v56  ;;  %v1196_v58 = vpop.f32.mrb[22].mxu0 }
 0x2a7   :  { %v1197_v3 = vpop.f32.mrb[23].mxu0 }
 0x2a8   :  { %v878_v59 = vadd.f32 %v1195_v29, %v1753_v36  ;;  %v1198_v60 = vadd.f32 %v1197_v3, %v1196_v58  ;;  %1268 = vmatmul.mubr.bf16.vlgmr.msra.gmra.mrb[36].mxu0 %v921_v21 }
 0x2aa   :  { %v881_v61 = vadd.f32 %v1198_v60, %v1753_v36  ;;  %v912_v62 = vmax.f32 %v878_v59, 0.0 }
 0x2ac   :  { %v913_v63 = vmax.f32 %v881_v61, 0.0  ;;  %v1199_v0 = vpop.f32.mrb[24].mxu0 }
 0x2ad   :  { %v1200_v1 = vpop.f32.mrb[25].mxu0 }
 0x2ae   :  { %v1201_v2 = vadd.f32 %v1200_v1, %v1199_v0  ;;  %v1202_v4 = vpop.f32.mrb[26].mxu0  ;;  %v922_v7 = vpack.c.bf16 %v913_v63, %v912_v62 }
 0x2af   :  { %v1203_v8 = vpop.f32.mrb[27].mxu0 }
 0x2b0   :  { %v886_v9 = vadd.f32 %v1201_v2, %v1753_v36  ;;  %v1204_v10 = vadd.f32 %v1203_v8, %v1202_v4  ;;  %1271 = vmatprep.mubr.bf16.mxu1 %v922_v7 }
 0x2b2   :  { %v889_v11 = vadd.f32 %v1204_v10, %v1753_v36  ;;  %v914_v12 = vmax.f32 %v886_v9, 0.0 }
 0x2b4   :  { %v915_v13 = vmax.f32 %v889_v11, 0.0  ;;  %v1205_v14 = vpop.f32.mrb[28].mxu0 }
 0x2b5   :  { %v1206_v15 = vpop.f32.mrb[29].mxu0 }
 0x2b6   :  { %v923_v19 = vpack.c.bf16 %v915_v13, %v914_v12  ;;  %v1207_v20 = vadd.f32 %v1206_v15, %v1205_v14  ;;  %v1208_v16 = vpop.f32.mrb[30].mxu0 }
 0x2b7   :  { %v1209_v23 = vpop.f32.mrb[31].mxu0 }
 0x2b8   :  { %v894_v24 = vadd.f32 %v1207_v20, %v1753_v36  ;;  %v1210_v26 = vadd.f32 %v1209_v23, %v1208_v16  ;;  %1272 = vmatmul.mubr.bf16.vlgmr.msra.gmra.mrb[24].mxu1 %v923_v19 }
 0x2ba   :  { %v897_v27 = vadd.f32 %v1210_v26, %v1753_v36  ;;  %v916_v28 = vmax.f32 %v894_v24, 0.0 }
 0x2bc   :  { %v917_v30 = vmax.f32 %v897_v27, 0.0  ;;  %v1211_v17 = vpop.f32.mrb[32].mxu0 }
 0x2bd   :  { %v1212_v31 = vpop.f32.mrb[33].mxu0 }
 0x2be   :  { %v1213_v32 = vadd.f32 %v1212_v31, %v1211_v17  ;;  %v1214_v33 = vpop.f32.mrb[34].mxu0  ;;  %v924_v22 = vpack.c.bf16 %v917_v30, %v916_v28 }
 0x2bf   :  { %v1215_v5 = vpop.f32.mrb[35].mxu0 }
 0x2c0   :  { %v902_v6 = vadd.f32 %v1213_v32, %v1753_v36  ;;  %v1216_v34 = vadd.f32 %v1215_v5, %v1214_v33  ;;  %1275 = vmatprep.mubr.bf16.mxu1 %v924_v22 }
 0x2c2   :  { %v905_v35 = vadd.f32 %v1216_v34, %v1753_v36  ;;  %v918_v25 = vmax.f32 %v902_v6, 0.0 }
 0x2c4   :  { %v919_v37 = vmax.f32 %v905_v35, 0.0 }
 0x2c6   :  { %v925_v38 = vpack.c.bf16 %v919_v37, %v918_v25 }
 0x2c8   :  { %1276 = vmatmul.mubr.bf16.gmra.mrb[28].mxu1 %v925_v38 }
 0x37b   :  { %v1269_v40 = vpop.f32.mrb[36].mxu0 }
 0x37c   :  { %v1040_v41 = vadd.f32 %v1269_v40, %v1143_v39  ;;  %v1031_v42 = vpop.f32.mrb[37].mxu0 }
 0x37d   :  { %v1032_v43 = vadd.f32 %v1143_v39, %v1031_v42  ;;  %v1270_v44 = vpop.f32.mrb[38].mxu0 }
 0x37e   :  { %1080 = vst.msk [vmem:[%s1831_s13 + $0x10] sm:$0xff] %vm161_vm1, %v1040_v41  ;;  %v1043_v45 = vadd.f32 %v1270_v44, %v1143_v39  ;;  %v1034_v36 = vpop.f32.mrb[39].mxu0 }
 0x37f   :  { %1078 = vst.msk [vmem:[%s1831_s13] sm:$0xff] %vm161_vm1, %v1032_v43  ;;  %v1035_v46 = vadd.f32 %v1143_v39, %v1034_v36 }
 0x380   :  { %1081 = vst.msk [vmem:[%s1831_s13 + $0x18] sm:$0xff] %vm161_vm1, %v1043_v45 }
 0x381   :  { %1079 = vst.msk [vmem:[%s1831_s13 + $0x8] sm:$0xff] %vm161_vm1, %v1035_v46 }
 0x38b   :  { %v1273_v47 = vpop.f32.mrb[24].mxu1 }
 0x38c   :  { %v1056_v48 = vadd.f32 %v1273_v47, %v1143_v39  ;;  %v1047_v49 = vpop.f32.mrb[25].mxu1 }
 0x38d   :  { %v1048_v18 = vadd.f32 %v1143_v39, %v1047_v49  ;;  %v1274_v50 = vpop.f32.mrb[26].mxu1 }
 0x38e   :  { %1084 = vst.msk [vmem:[%s1831_s13 + $0x30] sm:$0xff] %vm161_vm1, %v1056_v48  ;;  %v1059_v51 = vadd.f32 %v1274_v50, %v1143_v39  ;;  %v1050_v52 = vpop.f32.mrb[27].mxu1 }
 0x38f   :  { %1082 = vst.msk [vmem:[%s1831_s13 + $0x20] sm:$0xff] %vm161_vm1, %v1048_v18  ;;  %v1051_v53 = vadd.f32 %v1143_v39, %v1050_v52 }
 0x390   :  { %1085 = vst.msk [vmem:[%s1831_s13 + $0x38] sm:$0xff] %vm161_vm1, %v1059_v51 }
 0x391   :  { %1083 = vst.msk [vmem:[%s1831_s13 + $0x28] sm:$0xff] %vm161_vm1, %v1051_v53 }
 0x39b   :  { %v1277_v54 = vpop.f32.mrb[28].mxu1 }
 0x39c   :  { %v1072_v55 = vadd.f32 %v1277_v54, %v1143_v39  ;;  %v1063_v56 = vpop.f32.mrb[29].mxu1 }
 0x39d   :  { %v1064_v57 = vadd.f32 %v1143_v39, %v1063_v56  ;;  %v1278_v21 = vpop.f32.mrb[30].mxu1 }
 0x39e   :  { %1088 = vst.msk [vmem:[%s1831_s13 + $0x50] sm:$0xff] %vm161_vm1, %v1072_v55  ;;  %v1075_v29 = vadd.f32 %v1278_v21, %v1143_v39  ;;  %v1066_v58 = vpop.f32.mrb[31].mxu1 }
 0x39f   :  { %1086 = vst.msk [vmem:[%s1831_s13 + $0x40] sm:$0xff] %vm161_vm1, %v1064_v57  ;;  %v1067_v3 = vadd.f32 %v1143_v39, %v1066_v58 }
 0x3a0   :  { %1089 = vst.msk [vmem:[%s1831_s13 + $0x58] sm:$0xff] %vm161_vm1, %v1075_v29 }
 0x3a1   :  { %1087 = vst.msk [vmem:[%s1831_s13 + $0x48] sm:$0xff] %vm161_vm1, %v1067_v3 }

</bundles_post_ra>
